<compile_context>
chip_gen: v6e
topology: v6e:2x2x1
jax: 0.10.0
libtpu: 0.0.40
codegen_flags: <defaults>
</compile_context>

<pallas_src>
import functools

import jax
import jax.numpy as jnp
from jax import lax
from jax.experimental import pallas as pl
from jax.experimental.pallas import tpu as pltpu


# -----------------------------------------------------------------------------
# Kernel 1: fused q / [k|v] projection, computed once per token.
# -----------------------------------------------------------------------------
def _qkv_proj_kernel(x_ref, wq_ref, wkv_ref, q_ref, kv_ref):
    """x_ref: (1, TM, Cp) bf16; wq: (Cp, Cp) bf16 (scale folded); wkv: (Cp, 2Cp) bf16."""
    x = x_ref[0]
    q = jnp.dot(x, wq_ref[...], preferred_element_type=jnp.float32)
    kv = jnp.dot(x, wkv_ref[...], preferred_element_type=jnp.float32)
    q_ref[0] = q.astype(q_ref.dtype)
    kv_ref[0] = kv.astype(kv_ref.dtype)


def qkv_projection(x_bnc, wq, wkv, *, block_m):
    B, Np, Cp = x_bnc.shape
    nm = Np // block_m
    cost = pl.CostEstimate(
        flops=2 * B * Np * Cp * 3 * Cp,
        transcendentals=0,
        bytes_accessed=(int(x_bnc.size) * 2 + int(wq.size) * 2 + int(wkv.size) * 2
                        + B * Np * 3 * Cp * 2))
    return pl.pallas_call(
        _qkv_proj_kernel,
        out_shape=(jax.ShapeDtypeStruct((B, Np, Cp), jnp.bfloat16),
                   jax.ShapeDtypeStruct((B, Np, 2 * Cp), jnp.bfloat16)),
        grid_spec=pltpu.PrefetchScalarGridSpec(
            num_scalar_prefetch=0,
            grid=(B, nm),
            in_specs=[
                pl.BlockSpec((1, block_m, Cp), lambda b, i: (b, i, 0)),
                pl.BlockSpec((Cp, Cp), lambda b, i: (0, 0),
                             pipeline_mode=pl.Buffered(1)),        # constant weight
                pl.BlockSpec((Cp, 2 * Cp), lambda b, i: (0, 0),
                             pipeline_mode=pl.Buffered(1)),        # constant weight
            ],
            out_specs=[
                pl.BlockSpec((1, block_m, Cp), lambda b, i: (b, i, 0)),
                pl.BlockSpec((1, block_m, 2 * Cp), lambda b, i: (b, i, 0)),
            ],
        ),
        compiler_params=pltpu.CompilerParams(
            dimension_semantics=("parallel", "parallel"),
            vmem_limit_bytes=48 * 1024 * 1024),
        cost_estimate=cost,
    )(x_bnc, wq, wkv)


# -----------------------------------------------------------------------------
# Kernel 2: flash attention (online softmax over kv blocks) + fused output proj.
# -----------------------------------------------------------------------------
def _flash_attn_kernel(q_ref, kv_ref, wp_ref, bp_ref, o_ref,
                       acc_sc, m_sc, l_sc, stage_sc,
                       *, num_heads, head_dim, n_valid, mask_kv):
    """Grid: (batch, q_block, kv_block); kv_block is the reduction axis.

      q_ref   : (1, TQ, Cp)   bf16   pre-projected, pre-scaled queries
      kv_ref  : (1, TK, 2Cp)  bf16   pre-projected [k | v]
      wp_ref  : (Cp, Cp)      bf16   output projection
      bp_ref  : (1, Cp)       f32    output projection bias
      o_ref   : (1, TQ, Cp)   bf16   output block
      acc_sc  : (H, TQ, hd)   f32    un-normalized per-head output
      m_sc    : (H, TQ, 1)    f32    running row max
      l_sc    : (H, TQ, 1)    f32    running row sum
      stage_sc: (TQ, Cp)      bf16   normalized heads, staged for one proj GEMM
    """
    ki = pl.program_id(2)
    nk = pl.num_programs(2)
    cp = wp_ref.shape[0]
    tk = kv_ref.shape[1]

    @pl.when(ki == 0)
    def _init():
        m_sc[...] = jnp.full_like(m_sc, -jnp.inf)
        l_sc[...] = jnp.zeros_like(l_sc)
        acc_sc[...] = jnp.zeros_like(acc_sc)
        stage_sc[...] = jnp.zeros_like(stage_sc)   # padded channels must be 0

    if mask_kv:
        # Mask key columns that are sequence padding (N padded to the block).
        col = ki * tk + lax.broadcasted_iota(jnp.int32, (1, tk), 1)
        kv_valid = col < n_valid                                   # (1, TK)

    for h in range(num_heads):                      # static unroll; operands are
        lo = h * head_dim                           # ref-sliced per head so the
        q_h = q_ref[0, :, lo:lo + head_dim]         # live vreg set stays small
        k_h = kv_ref[0, :, lo:lo + head_dim]
        v_h = kv_ref[0, :, cp + lo:cp + lo + head_dim]

        # s = q @ k^T without materializing a transpose of k.
        s = lax.dot_general(q_h, k_h, (((1,), (1,)), ((), ())),
                            preferred_element_type=jnp.float32)    # (TQ, TK) f32
        if mask_kv:
            s = jnp.where(kv_valid, s, -jnp.inf)

        m_prev = m_sc[h]                                           # (TQ, 1)
        m_new = jnp.maximum(m_prev, jnp.max(s, axis=-1, keepdims=True))
        alpha = jnp.exp(m_prev - m_new)
        p = jnp.exp(s - m_new)                                     # (TQ, TK) f32
        m_sc[h] = m_new
        l_sc[h] = alpha * l_sc[h] + jnp.sum(p, axis=-1, keepdims=True)
        acc_sc[h] = alpha * acc_sc[h] + jnp.dot(
            p.astype(jnp.bfloat16), v_h, preferred_element_type=jnp.float32)

    @pl.when(ki == nk - 1)
    def _finalize():
        # Stage all normalized heads into one bf16 buffer, then ONE full-K
        # output-projection GEMM (instead of num_heads K=32 matmuls + adds).
        for h in range(num_heads):
            lo = h * head_dim
            inv_l = pl.reciprocal(l_sc[h], approx=True)            # (TQ, 1)
            stage_sc[:, lo:lo + head_dim] = (acc_sc[h] * inv_l).astype(stage_sc.dtype)
        y = jnp.dot(stage_sc[...], wp_ref[...],
                    preferred_element_type=jnp.float32) + bp_ref[...]
        o_ref[0] = y.astype(o_ref.dtype)


def attention_pallas(q_bnc, kv_bnc, wproj, bproj, *, num_heads, head_dim,
                     n_valid, block_q, block_k):
    """q: (B, Np, Cp) bf16 (scaled), kv: (B, Np, 2Cp) bf16. Returns (B, Np, Cp) bf16."""
    B, Np, Cp = q_bnc.shape
    nq, nk = Np // block_q, Np // block_k
    mask_kv = (Np != n_valid)

    kernel = functools.partial(_flash_attn_kernel, num_heads=num_heads,
                               head_dim=head_dim, n_valid=n_valid,
                               mask_kv=mask_kv)

    flops = (4 * B * num_heads * Np * Np * head_dim      # q@k^T and p@v
             + 2 * B * Np * Cp * Cp)                     # output projection
    cost = pl.CostEstimate(
        flops=flops,
        transcendentals=B * num_heads * Np * Np,
        bytes_accessed=(int(q_bnc.size) * 2 + int(kv_bnc.size) * 2 * nq
                        + int(wproj.size) * 2 + int(bproj.size) * 4
                        + B * Np * Cp * 2))

    return pl.pallas_call(
        kernel,
        out_shape=jax.ShapeDtypeStruct((B, Np, Cp), jnp.bfloat16),
        grid_spec=pltpu.PrefetchScalarGridSpec(
            num_scalar_prefetch=0,
            # NOTE(v7x): keep B*nq even when possible so the two TensorCores
            # split the parallel axes evenly.
            grid=(B, nq, nk),
            in_specs=[
                pl.BlockSpec((1, block_q, Cp), lambda b, qi, ki: (b, qi, 0)),
                pl.BlockSpec((1, block_k, 2 * Cp), lambda b, qi, ki: (b, ki, 0)),
                pl.BlockSpec((Cp, Cp), lambda b, qi, ki: (0, 0),
                             pipeline_mode=pl.Buffered(1)),         # constant weight
                pl.BlockSpec((1, Cp), lambda b, qi, ki: (0, 0),
                             pipeline_mode=pl.Buffered(1)),         # constant bias
            ],
            out_specs=pl.BlockSpec((1, block_q, Cp), lambda b, qi, ki: (b, qi, 0)),
            scratch_shapes=[
                pltpu.VMEM((num_heads, block_q, head_dim), jnp.float32),  # acc
                pltpu.VMEM((num_heads, block_q, 1), jnp.float32),         # m
                pltpu.VMEM((num_heads, block_q, 1), jnp.float32),         # l
                pltpu.VMEM((block_q, Cp), jnp.bfloat16),                  # stage
            ],
        ),
        compiler_params=pltpu.CompilerParams(
            dimension_semantics=("parallel", "parallel", "arbitrary"),
            vmem_limit_bytes=48 * 1024 * 1024),
        cost_estimate=cost,
    )(q_bnc, kv_bnc, wproj, bproj)


# -----------------------------------------------------------------------------
# Wrapper / parameter prep
# -----------------------------------------------------------------------------
def _choose_block(n, cp, num_heads, head_dim, target=256,
                  vmem_budget=40 * 1024 * 1024):
    """Largest multiple-of-128 block <= target that fits a v7x-safe VMEM budget."""
    n128 = ((n + 127) // 128) * 128
    target = max(128, (target // 128) * 128)

    def est(t):
        return (2 * t * cp * 2                      # q in   (double buffered)
                + 2 * t * 2 * cp * 2                # kv in  (double buffered)
                + cp * cp * 2 + cp * 4              # weights (single buffered)
                + 2 * t * cp * 2                    # out    (double buffered)
                + num_heads * t * 128 * 4           # acc (lane padded)
                + 2 * num_heads * t * 128 * 4       # m / l (lane padded)
                + t * cp * 2                        # stage
                + 2 * t * t * 4)                    # s / p intermediates headroom

    t = target
    while t > 128 and est(t) > vmem_budget:
        t -= 128
    return min(t, n128)


def init_params(key, dim, head_dim=32):
    """Deterministic synthetic parameters with PyTorch Linear shapes (f32)."""
    assert dim % head_dim == 0
    k1, k2, k3 = jax.random.split(key, 3)
    return {
        "wqkv": jax.random.normal(k1, (3 * dim, dim), jnp.float32) * 0.05,  # qkv.weight
        "wproj": jax.random.normal(k2, (dim, dim), jnp.float32) * 0.05,     # proj.weight
        "bproj": jax.random.normal(k3, (dim,), jnp.float32) * 0.05,         # proj.bias
    }


def prepare_kernel_params(params, *, dim, head_dim):
    """PyTorch-shaped f32 params -> kernel layout (transposed, scale-folded,
    channel-padded to a multiple of 128, bf16 weights / f32 bias)."""
    scale = float(head_dim) ** (-0.5)
    c_pad = ((dim + 127) // 128) * 128
    pad = c_pad - dim

    def pad2(w):
        return jnp.pad(w, ((0, pad), (0, pad)))

    wq_t = params["wqkv"][0:dim, :].T * scale          # scale folded into q weights
    wk_t = params["wqkv"][dim:2 * dim, :].T
    wv_t = params["wqkv"][2 * dim:3 * dim, :].T
    return {
        "wq": pad2(wq_t).astype(jnp.bfloat16),                                     # (Cp, Cp)
        "wkv": jnp.concatenate([pad2(wk_t), pad2(wv_t)], 1).astype(jnp.bfloat16),  # (Cp, 2Cp)
        "wproj": pad2(params["wproj"].T).astype(jnp.bfloat16),                     # (Cp, Cp)
        "bproj": jnp.pad(params["bproj"], (0, pad)).reshape(1, c_pad).astype(jnp.float32),
    }


def metaformer_attention(x, kparams, *, head_dim=32, block_target=256,
                         out_dtype=None):
    """Forward pass matching the PyTorch module; x is [B, C, H, W] or [B, N, C]."""
    shape = x.shape
    is_4d = len(shape) == 4
    if is_4d:
        b, c, h, w = shape
        n = h * w
        # flatten(start_dim=2).transpose(-2, -1) -> (B, N, C)
        x_bnc = jnp.transpose(jnp.reshape(x, (b, c, n)), (0, 2, 1))
    else:
        b, n, c = shape
        x_bnc = x
    assert c % head_dim == 0, "dim should be divisible by head_dim"
    num_heads = c // head_dim
    cp = kparams["wq"].shape[0]

    # Lane/MXU-friendly block (multiple of 128), VMEM budget safe for v7x.
    t = _choose_block(n, cp, num_heads, head_dim, target=block_target)
    n_pad = ((n + t - 1) // t) * t

    if cp != c or n_pad != n:
        x_bnc = jnp.pad(x_bnc, ((0, 0), (0, n_pad - n), (0, cp - c)))
    x_bnc = x_bnc.astype(jnp.bfloat16)

    # q / [k|v] projections: computed exactly once per token.
    q, kv = qkv_projection(x_bnc, kparams["wq"], kparams["wkv"], block_m=t)
    y = attention_pallas(q, kv, kparams["wproj"], kparams["bproj"],
                         num_heads=num_heads, head_dim=head_dim, n_valid=n,
                         block_q=t, block_k=t)

    y = y[:, :n, :c]                                   # drop seq/channel padding
    if out_dtype is not None:
        y = y.astype(out_dtype)
    if is_4d:
        # transpose(-2,-1).reshape(b, c, h, w)
        y = jnp.reshape(jnp.transpose(y, (0, 2, 1)), (b, c, h, w))
    return y


def _reference(x, params, *, head_dim=32):
    """Pure-JAX f32 reference mirroring the PyTorch forward."""
    b, c, h, w = x.shape
    n = h * w
    num_heads = c // head_dim
    scale = head_dim ** (-0.5)
    xb = jnp.transpose(jnp.reshape(x, (b, c, n)), (0, 2, 1))          # (B,N,C)
    qkv = xb @ params["wqkv"].T                                        # (B,N,3C)
    qkv = qkv.reshape(b, n, 3, num_heads, head_dim)
    qkv = jnp.transpose(qkv, (2, 0, 3, 1, 4))                          # (3,B,H,N,hd)
    q, k, v = qkv[0], qkv[1], qkv[2]
    attn = jnp.einsum("bhnd,bhmd->bhnm", q * scale, k)
    attn = jax.nn.softmax(attn, axis=-1)
    out = jnp.einsum("bhnm,bhmd->bhnd", attn, v)
    out = jnp.transpose(out, (0, 2, 1, 3)).reshape(b, n, c)
    out = out @ params["wproj"].T + params["bproj"]
    return jnp.reshape(jnp.transpose(out, (0, 2, 1)), (b, c, h, w))


if __name__ == "__main__":
    # dim must be divisible by head_dim=32 -> channels=64; 16x12 spatial -> N=192,
    # which with block_target=128 exercises multiple q/kv blocks (online softmax)
    # AND the padded-key masking path (N padded 192 -> 256).
    B, C, H, W = 2, 64, 16, 12
    HEAD_DIM = 32

    key = jax.random.PRNGKey(0)
    kx, kp = jax.random.split(key)
    x = jax.random.normal(kx, (B, C, H, W), jnp.float32)
    params = init_params(kp, dim=C, head_dim=HEAD_DIM)
    kparams = prepare_kernel_params(params, dim=C, head_dim=HEAD_DIM)

    y = metaformer_attention(x, kparams, head_dim=HEAD_DIM, block_target=128,
                             out_dtype=jnp.float32)
    y = jax.block_until_ready(y)

    y_ref = _reference(x, params, head_dim=HEAD_DIM)
    assert y.shape == (B, C, H, W)
    # bf16 MXU operands / bf16 kernel output with f32 accumulation.
    err = float(jnp.max(jnp.abs(y - y_ref)))
    assert jnp.allclose(y, y_ref, atol=2e-2, rtol=2e-2), err
    print("KERNEL_OK")
</pallas_src>

<mosaic_0001>
module attributes {stable_mosaic.version = 11 : i64} {
  func.func @_qkv_proj_kernel(%arg0: i32, %arg1: i32, %arg2: memref<1x128x128xbf16, #tpu.memory_space<vmem>>, %arg3: memref<128x128xbf16, #tpu.memory_space<vmem>>, %arg4: memref<128x256xbf16, #tpu.memory_space<vmem>>, %arg5: memref<1x128x128xbf16, #tpu.memory_space<vmem>>, %arg6: memref<1x128x256xbf16, #tpu.memory_space<vmem>>) attributes {dimension_semantics = [#tpu.dimension_semantics<parallel>, #tpu.dimension_semantics<parallel>], iteration_bounds = array<i64: 2, 2>, scalar_prefetch = 0 : i64, scratch_operands = 0 : i64, tpu.core_type = #tpu.core_type<tc>, window_params = [{transform_indices = @transform_0, window_bounds = array<i64: 1, 128, 128>}, {pipeline_mode = #tpu.pipeline_mode<synchronous>, transform_indices = @transform_1, window_bounds = array<i64: 128, 128>}, {pipeline_mode = #tpu.pipeline_mode<synchronous>, transform_indices = @transform_2, window_bounds = array<i64: 128, 256>}, {transform_indices = @transform_3, window_bounds = array<i64: 1, 128, 128>}, {transform_indices = @transform_4, window_bounds = array<i64: 1, 128, 256>}]} {
    %c0 = arith.constant 0 : index
    %c0_0 = arith.constant 0 : index
    %c0_1 = arith.constant 0 : index
    %0 = vector.load %arg2[%c0, %c0_0, %c0_1] : memref<1x128x128xbf16, #tpu.memory_space<vmem>>, vector<1x128x128xbf16>
    %1 = vector.shape_cast %0 : vector<1x128x128xbf16> to vector<128x128xbf16>
    %c0_2 = arith.constant 0 : index
    %c0_3 = arith.constant 0 : index
    %2 = vector.load %arg3[%c0_2, %c0_3] : memref<128x128xbf16, #tpu.memory_space<vmem>>, vector<128x128xbf16>
    %cst = arith.constant dense<0.000000e+00> : vector<128x128xf32>
    %3 = tpu.matmul %1, %2, %cst {dimension_numbers = #tpu.dot_dimension_numbers<[1], [0], [0], [1], [0, 0, 1, 1], [], []>} : vector<128x128xbf16>, vector<128x128xbf16>, vector<128x128xf32> -> vector<128x128xf32>
    %c0_4 = arith.constant 0 : index
    %c0_5 = arith.constant 0 : index
    %4 = vector.load %arg4[%c0_4, %c0_5] : memref<128x256xbf16, #tpu.memory_space<vmem>>, vector<128x256xbf16>
    %cst_6 = arith.constant dense<0.000000e+00> : vector<128x256xf32>
    %5 = tpu.matmul %1, %4, %cst_6 {dimension_numbers = #tpu.dot_dimension_numbers<[1], [0], [0], [1], [0, 0, 1, 1], [], []>} : vector<128x128xbf16>, vector<128x256xbf16>, vector<128x256xf32> -> vector<128x256xf32>
    %6 = arith.truncf %3 : vector<128x128xf32> to vector<128x128xbf16>
    %c0_7 = arith.constant 0 : index
    %c0_8 = arith.constant 0 : index
    %c0_9 = arith.constant 0 : index
    %7 = vector.load %arg5[%c0_7, %c0_8, %c0_9] : memref<1x128x128xbf16, #tpu.memory_space<vmem>>, vector<1x128x128xbf16>
    %8 = vector.shape_cast %7 : vector<1x128x128xbf16> to vector<128x128xbf16>
    %9 = vector.shape_cast %6 : vector<128x128xbf16> to vector<1x128x128xbf16>
    tpu.vector_store %arg5[%c0_7, %c0_8, %c0_9], %9 {strides = array<i32>} : memref<1x128x128xbf16, #tpu.memory_space<vmem>>, vector<1x128x128xbf16>,
    %10 = arith.truncf %5 : vector<128x256xf32> to vector<128x256xbf16>
    %c0_10 = arith.constant 0 : index
    %c0_11 = arith.constant 0 : index
    %c0_12 = arith.constant 0 : index
    %11 = vector.load %arg6[%c0_10, %c0_11, %c0_12] : memref<1x128x256xbf16, #tpu.memory_space<vmem>>, vector<1x128x256xbf16>
    %12 = vector.shape_cast %11 : vector<1x128x256xbf16> to vector<128x256xbf16>
    %13 = vector.shape_cast %10 : vector<128x256xbf16> to vector<1x128x256xbf16>
    tpu.vector_store %arg6[%c0_10, %c0_11, %c0_12], %13 {strides = array<i32>} : memref<1x128x256xbf16, #tpu.memory_space<vmem>>, vector<1x128x256xbf16>,
    return
  }
  func.func @transform_0(%arg0: i32, %arg1: i32) -> (i32, i32, i32) {
    %c0_i32 = arith.constant 0 : i32
    %c0_i32_0 = arith.constant 0 : i32
    return %arg0, %arg1, %c0_i32 : i32, i32, i32
  }
  func.func @transform_1(%arg0: i32, %arg1: i32) -> (i32, i32) {
    %c0_i32 = arith.constant 0 : i32
    %c0_i32_0 = arith.constant 0 : i32
    %c0_i32_1 = arith.constant 0 : i32
    return %c0_i32, %c0_i32_0 : i32, i32
  }
  func.func @transform_2(%arg0: i32, %arg1: i32) -> (i32, i32) {
    %c0_i32 = arith.constant 0 : i32
    %c0_i32_0 = arith.constant 0 : i32
    %c0_i32_1 = arith.constant 0 : i32
    return %c0_i32, %c0_i32_0 : i32, i32
  }
  func.func @transform_3(%arg0: i32, %arg1: i32) -> (i32, i32, i32) {
    %c0_i32 = arith.constant 0 : i32
    %c0_i32_0 = arith.constant 0 : i32
    return %arg0, %arg1, %c0_i32 : i32, i32, i32
  }
  func.func @transform_4(%arg0: i32, %arg1: i32) -> (i32, i32, i32) {
    %c0_i32 = arith.constant 0 : i32
    %c0_i32_0 = arith.constant 0 : i32
    return %arg0, %arg1, %c0_i32 : i32, i32, i32
  }
}

</mosaic_0001>

<bundles_post_ra>
// kernel: tpu_custom_call.1
= control target key start
LH: loop header
LB: loop body
LE: loop exit
PB: predicated region body
PF: predicated region fallthrough
CT: control target
= control target key end

     0   :  { %s2036_s0 = inlined_call_operand.hbm [shape: bf16[2,256,128], index: 0, kind: input, shape index: {}]   ;;  %s2037_s1 = inlined_call_operand.hbm [shape: bf16[128,128], index: 1, kind: input, shape index: {}]   ;;  %s2038_s2 = inlined_call_operand.hbm [shape: bf16[128,256], index: 2, kind: input, shape index: {}]   ;;  %s2039_s3 = inlined_call_operand.hbm [shape: bf16[2,256,128], index: 3, kind: output, shape index: {0}]   ;;  %s2040_s4 = inlined_call_operand.hbm [shape: bf16[2,256,256], index: 4, kind: output, shape index: {1}]  }
   0x1   :  { %2049 = sst [smem:[#allocation18_spill]] %s2037_s1 }
   0x2   :  { %2050 = sst [smem:[#allocation19_spill]] %s2038_s2 }
   0x3   :  { %2051 = sst [smem:[#allocation20_spill]] %s2039_s3 }
   0x4   :  { %2052 = sst [smem:[#allocation21_spill]] %s2040_s4 }
   0x5   :  { %10 = vsyncpa [#allocation3], 0 }
   0x6   :  { %12 = vsyncpa [#allocation3 + $0x1], 0 }
   0x7   :  { %13 = vsyncpa [#allocation6], 0 }
   0x8   :  { %14 = vsyncpa [#allocation4], 0 }
   0x9   :  { %16 = vsyncpa [#allocation4 + $0x1], 0 }
   0xa   :  { %17 = vsyncpa [#allocation10], 0 }
   0xb   :  { %19 = vsyncpa [#allocation10 + $0x1], 0  ;;  %s1729_s15 = smov 0   ;;  %s1731_s16 = smov 0  }
   0xc   :  { %s1733_s17 = smov 0   ;;  %s1735_s18 = smov 0  }
   0xd   :  { %s1737_s19 = smov 0   ;;  %s1739_s20 = smov 0  }
   0xe   :  { %s1741_s21 = smov 0   ;;  %s1743_s22 = smov 0  }
   0xf LB: > { %2053 = sst [smem:[#allocation15_spill]] %s1660_s15  ;;  %s1090_s23 = sadd.s32 4294967295, %s1688_s22   ;;  %s1688_s22 = sphi %s1743_s22, %s25_s22   ;;  %s1684_s21 = sphi %s1741_s21, %s2082_s21   ;;  %s1680_s20 = sphi %s1739_s20, %s2081_s20   ;;  %s1676_s19 = sphi %s1737_s19, %s2080_s19   ;;  %s1672_s18 = sphi %s1735_s18, %s2079_s18   ;;  %s1668_s17 = sphi %s1733_s17, %s2078_s17   ;;  %s1664_s16 = sphi %s1731_s16, %s2077_s16   ;;  %s1660_s15 = sphi %s1729_s15, %s2076_s15  }
  0x10   : > { %s1091_s24 = sadd.s32 4294967294, %s1688_s22   ;;  %p59_p0 = scmp.ne.s32.totalorder %s1664_s16, %s1660_s15 }
  0x11   : > { %p1773_p1 = scmp.eq.s32.totalorder %s1090_s23, 0  ;;  %p1777_p2 = scmp.eq.s32.totalorder %s1090_s23, 3 }
  0x12   : > { %p133_p3 = scmp.eq.s32.totalorder %s1091_s24, 3  ;;  %p1092_p5 = scmp.ge.s32.totalorder %s1688_s22, 1 }
  0x13   : > { %p1783_p4 = por %p1773_p1, %p59_p0  ;;  %p168_p7 = scmp.lt.s32.totalorder %s1688_s22, 5 }
  0x14   : > { %p1788_p6 = por %p133_p3, %p59_p0  ;;  %s1690_s30 = smov [#allocation5]  }
  0x15   : > { %p1793_p8 = pnand %p1092_p5, %p168_p7  ;;  %s180_s5 = sshll.u32 %s1690_s30, 4  ;;  %s181_s5 = int_to_ptr.vmem [resolvable:$true] %s180_s5 }
  0x16   : > { %s2057_s28 = scalar_select %p1788_p6, 1, 0 }
  0x17   : > { %p1339_p9 = pneg %p1793_p8  ;;  %s1691_s7 = smov [#allocation7]  }
  0x18   : > { %2058 = sst [smem:[#allocation16_spill]] %s2057_s28  ;;  %s193_s8 = sshll.u32 %s1691_s7, 4  ;;  %s194_s8 = int_to_ptr.vmem [resolvable:$true] %s193_s8 }
  0x19   : > { %p1801_p10 = pnand %p1339_p9, %p1773_p1  ;;  %s1489_s9 = scalar_lea.vmem %s181_s5, 1024 }
  0x1a   : > { %p1490_p12 = scmp.ne.s32.totalorder %s181_s5, %s1489_s9  ;;  %p1497_p3 = scmp.lt.s32.totalorder %s181_s5, %s181_s5 }
  0x1b   : > { %p1480_p11 = pneg %p1801_p10  ;;  %p1498_p5 = scmp.lt.s32.totalorder %s1489_s9, %s1489_s9 }
  0x1d   : > { %p1492_p13 = pnand %p1490_p12, %p1480_p11  ;;  %p1499_p7 = por %p1498_p5, %p1497_p3 }
  0x1f   : > { %p1493_p0 = pneg %p1492_p13 }
  0x21   : > { %p1500_p9 = pnand %p1499_p7, %p1493_p0 }
  0x23   : > { %1503 = shalt.err (!%p1500_p9)
}
  0x24   : > { %s2041_s10 = smov 64   ;;  %s2042_s11 = smov 4  }
  0x25   : > { %s2061_s1 = sld [smem:[#allocation18_spill]]  ;;  %s1515_s14 = scalar_lea.vmem %s194_s8, 2048 }
  0x26   : > { %p1516_p12 = scmp.ne.s32.totalorder %s194_s8, %s1515_s14  ;;  %p1523_p0 = scmp.lt.s32.totalorder %s194_s8, %s194_s8 }
  0x27   : > { %p1524_p5 = scmp.lt.s32.totalorder %s1515_s14, %s1515_s14 }
  0x28   : > { %p1518_p13 = pnand %p1516_p12, %p1480_p11 }
  0x29   : > { %p1525_p7 = por %p1524_p5, %p1523_p0 }
  0x2a   : > { %p1519_p3 = pneg %p1518_p13 }
  0x2b   : > { %1342 = dma.hbm_to_vmem [thread:$0]  (!%p1801_p10), %s2061_s1, 1024, %s181_s5, [#allocation6], %s2041_s10, %s2041_s10, %s2042_s11  }
  0x2c   : > { %p1526_p9 = pnand %p1525_p7, %p1519_p3 }
  0x2e   : > { %1529 = shalt.err (!%p1526_p9)
}
  0x2f   : > { %s1694_s23 = smov 128   ;;  %s1695_s24 = smov 8  }
  0x30   : > { %s2062_s2 = sld [smem:[#allocation19_spill]]  ;;  %s34_s7 = sadd.s32 1, %s1680_s20 }
  0x31   : > { %s37_s9 = sadd.s32 1, %s1684_s21  ;;  %p35_p11 = scmp.ge.s32.totalorder %s34_s7, 2 }
  0x32   : > { %s46_s12 = sadd.s32 1, %s1668_s17  ;;  %p53_p12 = scmp.ne.s32.totalorder %s1668_s17, %s1664_s16 }
  0x33   : > { %p54_p13 = scmp.eq.s32.totalorder %s1688_s22, 0  ;;  %s2084_s7 = smov (%p35_p11, %s34_s7), 0 }
  0x34   : > { %2063 = sst [smem:[#allocation17_spill]] %s2084_s7  ;;  %s2086_s9 = smov (!%p35_p11, %s37_s9), %s1684_s21 }
  0x35   : > { %s42_s13 = ssub.s32 %s1680_s20, %s2084_s7  ;;  %p1837_p3 = por %p54_p13, %p53_p12 }
  0x36   : > { %1345 = dma.hbm_to_vmem [thread:$0]  (!%p1801_p10), %s2062_s2, 2048, %s194_s8, [#allocation6], %s1694_s23, %s1694_s23, %s1695_s24  }
  0x37   : > { %p39_p10 = scmp.ge.s32.totalorder %s2086_s9, 2  ;;  %p1843_p0 = por %p1777_p2, %p53_p12 }
  0x38   : > { %p1359_p5 = scmp.lt.s32.totalorder %s1688_s22, 4  ;;  %s207_s14 = sand.u32 1, %s1668_s17  }
  0x39   : > { %s2065_s8 = scalar_select %p1843_p0, 1, 0 }
  0x3a   : > { %s2088_s9 = smov (%p39_p10, %s2086_s9), 0  ;;  %s1096_s23 = sshll.u32 %s207_s14, 6 }
  0x3b   : > { %s41_s24 = ssub.s32 %s1684_s21, %s2088_s9  ;;  %s1097_s5 = sshll.u32 %s1680_s20, 4 }
  0x3c   : > { %s43_s30 = sor.u32 %s42_s13, %s41_s24  ;;  %s1098_s10 = sshll.u32 %s1684_s21, 5 }
  0x3d   : > { %p44_p7 = scmp.eq.s32.totalorder %s43_s30, 0  ;;  %s217_s11 = sadd.s32 %s1098_s10, %s1097_s5 }
  0x3e   : > { %s211_s1 = scalar_lea.vmem [#allocation2], %s1096_s23  ;;  %s1099_s7 = sshll.u32 %s217_s11, 6 }
  0x3f   : > { %s220_s26 = sshll.u32 %s211_s1, 4  ;;  %s219_s4 = scalar_lea.hbm %s2036_s0, %s1099_s7  ;;  %s221_s26 = int_to_ptr.vmem [resolvable:$true] %s220_s26 }
  0x40   : > { %s1856_s2 = scalar_select %p44_p7, %s1668_s17, %s46_s12  }
  0x41   : > { %p1865_p2 = pnand %p1359_p5, %p1837_p3  ;;  %s208_s13 = scalar_lea.sflag [#allocation3], %s207_s14 }
  0x42   : > { %s1543_s10 = scalar_lea.vmem %s221_s26, 1024  ;;  %s1696_s1 = smov [#allocation2]  }
  0x43   : > { %p1532_p9 = pneg %p1865_p2  ;;  %p1544_p11 = scmp.ne.s32.totalorder %s221_s26, %s1543_s10 }
  0x44   : > { %s1548_s11 = sshll.u32 %s1696_s1, 4  ;;  %s1549_s11 = int_to_ptr.vmem [resolvable:$false] %s1548_s11 }
  0x45   : > { %p1546_p12 = pnand %p1544_p11, %p1532_p9  ;;  %s1550_s12 = scalar_lea.vmem %s1549_s11, 2048 }
  0x46   : > { %p1551_p10 = scmp.lt.s32.totalorder %s221_s26, %s1549_s11  ;;  %p1552_p7 = scmp.lt.s32.totalorder %s1550_s12, %s1543_s10 }
  0x47   : > { %p1547_p13 = pneg %p1546_p12 }
  0x48   : > { %p1553_p6 = por %p1552_p7, %p1551_p10 }
  0x4a   : > { %p1554_p0 = pnand %p1553_p6, %p1547_p13 }
  0x4c   : > { %1557 = shalt.err (!%p1554_p0)
}
  0x4d   : > { %s2067_s15 = smov 4   ;;  %s2068_s28 = smov 64  }
  0x4e   : > { %1349 = dma.hbm_to_vmem [thread:$0]  (!%p1865_p2), %s219_s4, 1024, %s221_s26, %s208_s13, %s2068_s28, %s2068_s28, %s2067_s15  }
  0x4f   : > { %232 = sbr.rel (%p1793_p8) target bundleno = 387 (0x183), region = 32  ;;  %s1879_s7 = sand.u32 (!%p1793_p8), 1, %s1664_s16  }
  0x50   : > { %s1101_s6 = sshll.u32 (!%p1793_p8), %s1879_s7, 6  ;;  %s235_s14 = scalar_lea.sflag (!%p1793_p8), [#allocation3], %s1879_s7 }
  0x51   : > { %s1885_s23 = scalar_lea.vmem (!%p1793_p8), [#allocation2], %s1101_s6 }
  0x54   : > { %1643 = dma.done.wait (%p1783_p4), %s235_s14, 1024  }
  0x55   : > { %1645 = vsyncadd (%p1783_p4), %s235_s14, 4294966272 }
  0x56   : > { %1647 = dma.done.wait (%p1773_p1), [#allocation6], 3072  }
  0x57   : > { %1649 = vsyncadd (%p1773_p1), [#allocation6], 4294964224  ;;  %v1697_v0 = vmov 0   ;;  %v1438_v1 = vld [vmem:[#allocation5 + $0x38] sm:$0xff]   ;;  %v1442_v4 = vld [vmem:[#allocation5 + $0x30] sm:$0xff]   ;;  %s1105_s3 = sshll.u32 %s1879_s7, 7 }
  0x58   : > { %653 = vmatprep.mubr.bf16.mxu1 %v1697_v0  ;;  %v1439_v2 = vld [vmem:[#allocation7 + $0x74] ss:$8 sps:$4 sm:$0xff]   ;;  %1277 = vmatprep.subr.bf16.mxu0 %v1438_v1  ;;  %v1441_v3 = vld [vmem:[#allocation7 + $0x70] ss:$8 sps:$4 sm:$0xff]   ;;  %v1443_v5 = vld [vmem:[#allocation7 + $0x64] ss:$8 sps:$4 sm:$0xff]  }
  0x59   : > { %1309 = vmatprep.subr.bf16.mxu1 %v1439_v2  ;;  %1278 = vmatpush3.bf16.msra.mxu0 %v1438_v1  ;;  %v1445_v6 = vld [vmem:[#allocation7 + $0x60] ss:$8 sps:$4 sm:$0xff]   ;;  %v1447_v8 = vld [vmem:[#allocation7 + $0x54] ss:$8 sps:$4 sm:$0xff]   ;;  %v1449_v9 = vld [vmem:[#allocation7 + $0x50] ss:$8 sps:$4 sm:$0xff]  }
  0x5a   : > { %1317 = vmatpush1.bf16.msra.mxu1 %v1441_v3  ;;  %1279 = vmatprep.subr.bf16.mxu0 %v1442_v4  ;;  %v1446_v7 = vld [vmem:[#allocation5 + $0x28] sm:$0xff]   ;;  %v1450_v10 = vld [vmem:[#allocation5 + $0x20] sm:$0xff]   ;;  %v1454_v13 = vld [vmem:[#allocation5 + $0x18] sm:$0xff]   ;;  %s1912_s4 = scalar_lea.vmem [#allocation9], %s1105_s3  ;;  %s1917_s25 = scalar_lea.vmem [#allocation8], %s1101_s6 }
  0x5b   : > { %1310 = vmatprep.subr.bf16.mxu1 %v1443_v5  ;;  %v1451_v11 = vld [vmem:[#allocation7 + $0x44] ss:$8 sps:$4 sm:$0xff]   ;;  %v1453_v12 = vld [vmem:[#allocation7 + $0x40] ss:$8 sps:$4 sm:$0xff]   ;;  %v1455_v14 = vld [vmem:[#allocation7 + $0x34] ss:$8 sps:$4 sm:$0xff]  }
  0x5c   : > { %v1457_v15 = vld [vmem:[#allocation7 + $0x30] ss:$8 sps:$4 sm:$0xff]   ;;  %v1459_v17 = vld [vmem:[#allocation7 + $0x24] ss:$8 sps:$4 sm:$0xff]   ;;  %v1461_v18 = vld [vmem:[#allocation7 + $0x20] ss:$8 sps:$4 sm:$0xff]  }
  0x5d   : > { %1280 = vmatpush3.bf16.msra.mxu0 %v1442_v4  ;;  %v1458_v16 = vld [vmem:[#allocation5 + $0x10] sm:$0xff]   ;;  %v1470_v19 = vld [vmem:[%s1885_s23] sm:$0xff]   ;;  %v1462_v20 = vld [vmem:[#allocation5 + $0x8] sm:$0xff]   ;;  %s1172_s27 = sshll.u32 %s1672_s18, 4  ;;  %s1173_s29 = sshll.u32 %s1676_s19, 5 }
  0x5e   : > { %1318 = vmatpush1.bf16.msra.mxu1 %v1445_v6  ;;  %1281 = vmatprep.subr.bf16.mxu0 %v1446_v7  ;;  %v1463_v21 = vld [vmem:[#allocation7 + $0x14] ss:$8 sps:$4 sm:$0xff]   ;;  %v1465_v22 = vld [vmem:[#allocation7 + $0x10] ss:$8 sps:$4 sm:$0xff]   ;;  %v1466_v23 = vld [vmem:[#allocation5] sm:$0xff]   ;;  %s924_s24 = sadd.s32 %s1173_s29, %s1172_s27  ;;  %s927_s30 = sshll.u32 %s1917_s25, 4  ;;  %s1933_s30 = int_to_ptr.vmem [resolvable:$true] %s927_s30 }
  0x5f   : > { %1311 = vmatprep.subr.bf16.mxu1 %v1447_v8  ;;  %1293 = vmatprep.mubr.bf16.mxu0 %v1470_v19  ;;  %v1467_v24 = vld [vmem:[#allocation7 + $0x4] ss:$8 sps:$4 sm:$0xff]   ;;  %v1469_v25 = vld [vmem:[#allocation7] ss:$8 sps:$4 sm:$0xff]   ;;  %v1472_v27 = vld [vmem:[%s1885_s23 + $0x10] sm:$0xff]   ;;  %s1174_s5 = sshll.u32 %s924_s24, 6 }
  0x60   : > { %v1471_v26 = vld [vmem:[%s1885_s23 + $0x8] sm:$0xff]   ;;  %v1473_v28 = vld [vmem:[%s1885_s23 + $0x18] sm:$0xff]   ;;  %v1474_v29 = vld [vmem:[%s1885_s23 + $0x20] sm:$0xff]   ;;  %s2069_s10 = sld [smem:[#allocation20_spill]]  ;;  %s907_s11 = scalar_lea.sflag [#allocation4], %s1879_s7 }
  0x61   : > { %1282 = vmatpush3.bf16.msra.mxu0 %v1446_v7  ;;  %v1475_v30 = vld [vmem:[%s1885_s23 + $0x28] sm:$0xff]   ;;  %v1476_v31 = vld [vmem:[%s1885_s23 + $0x30] sm:$0xff]   ;;  %v1477_v32 = vld [vmem:[%s1885_s23 + $0x38] sm:$0xff]   ;;  %s1558_s12 = scalar_lea.vmem %s1933_s30, 1024  ;;  %p2070_p4 = scmp.ne.s32.totalorder %s2065_s8, 0 }
  0x62   : > { %1319 = vmatpush1.bf16.msra.mxu1 %v1449_v9  ;;  %1283 = vmatprep.subr.bf16.mxu0 %v1450_v10  ;;  %p1559_p1 = scmp.ne.s32.totalorder %s1933_s30, %s1558_s12  ;;  %s1698_s15 = smov [#allocation8]  }
  0x63   : > { %1312 = vmatprep.subr.bf16.mxu1 %v1451_v11  ;;  %s1562_s28 = sshll.u32 %s1698_s15, 4  ;;  %s1563_s28 = int_to_ptr.vmem [resolvable:$false] %s1562_s28 }
  0x64   : > { %p1560_p6 = pnand %p1559_p1, %p2070_p4  ;;  %s1564_s6 = scalar_lea.vmem %s1563_s28, 2048 }
  0x65   : > { %1284 = vmatpush3.bf16.msra.mxu0 %v1450_v10  ;;  %p1565_p3 = scmp.lt.s32.totalorder %s1933_s30, %s1563_s28  ;;  %p1566_p0 = scmp.lt.s32.totalorder %s1564_s6, %s1558_s12 }
  0x66   : > { %1320 = vmatpush1.bf16.msra.mxu1 %v1453_v12  ;;  %1285 = vmatprep.subr.bf16.mxu0 %v1454_v13  ;;  %s1939_s1 = scalar_lea.hbm %s2069_s10, %s1174_s5  ;;  %p1561_p8 = pneg %p1560_p6 }
  0x67   : > { %1313 = vmatprep.subr.bf16.mxu1 %v1455_v14  ;;  %p1567_p5 = por %p1566_p0, %p1565_p3 }
  0x69   : > { %1286 = vmatpush3.bf16.msra.mxu0 %v1454_v13  ;;  %p1568_p2 = pnand %p1567_p5, %p1561_p8 }
  0x6a   : > { %1321 = vmatpush1.bf16.msra.mxu1 %v1457_v15  ;;  %1287 = vmatprep.subr.bf16.mxu0 %v1458_v16 }
  0x6b   : > { %1314 = vmatprep.subr.bf16.mxu1 %v1459_v17 }
  0x6d   : > { %1288 = vmatpush3.bf16.msra.mxu0 %v1458_v16 }
  0x6e   : > { %1322 = vmatpush1.bf16.msra.mxu1 %v1461_v18  ;;  %1289 = vmatprep.subr.bf16.mxu0 %v1462_v20 }
  0x6f   : > { %1315 = vmatprep.subr.bf16.mxu1 %v1463_v21 }
  0x71   : > { %1290 = vmatpush3.bf16.msra.mxu0 %v1462_v20 }
  0x72   : > { %1323 = vmatpush1.bf16.msra.mxu1 %v1465_v22  ;;  %1291 = vmatprep.subr.bf16.mxu0 %v1466_v23 }
  0x73   : > { %1316 = vmatprep.subr.bf16.mxu1 %v1467_v24 }
  0x75   : > { %1292 = vmatpush3.bf16.msra.mxu0 %v1466_v23 }
  0x76   : > { %1324 = vmatpush1.bf16.msra.mxu1 %v1469_v25  ;;  %601 = vmatprep.subr.bf16.mxu0 %v1439_v2 }
  0x78   : > { %1294 = vmatmul.mubr.bf16.vlgmr.msra.gmra.mxu0 %v1471_v26 }
  0x79   : > { %654 = vmatmul.mubr.bf16.vlgmr.msra.gmra.mxu1 %v1472_v27  ;;  %602 = vmatpush1.bf16.msra.mxu0 %v1441_v3 }
  0x7a   : > { %603 = vmatprep.subr.bf16.mxu0 %v1443_v5  ;;  %1297 = vmatprep.mubr.bf16.mxu0 %v1472_v27 }
  0x7b   : > { %663 = vmatprep.mubr.bf16.mxu1 %v1697_v0 }
  0x7d   : > { %604 = vmatpush1.bf16.msra.mxu0 %v1445_v6 }
  0x7e   : > { %605 = vmatprep.subr.bf16.mxu0 %v1447_v8 }
  0x80   : > { %1298 = vmatmul.mubr.bf16.gmra.mxu0 %v1473_v28 }
  0x81   : > { %664 = vmatmul.mubr.bf16.gmra.mxu1 %v1473_v28  ;;  %606 = vmatpush1.bf16.msra.mxu0 %v1449_v9 }
  0x82   : > { %607 = vmatprep.subr.bf16.mxu0 %v1451_v11  ;;  %1301 = vmatprep.mubr.bf16.mxu0 %v1474_v29 }
  0x83   : > { %673 = vmatprep.mubr.bf16.mxu1 %v1697_v0 }
  0x85   : > { %608 = vmatpush1.bf16.msra.mxu0 %v1453_v12 }
  0x86   : > { %609 = vmatprep.subr.bf16.mxu0 %v1455_v14 }
  0x88   : > { %1302 = vmatmul.mubr.bf16.gmra.mxu0 %v1475_v30 }
  0x89   : > { %674 = vmatmul.mubr.bf16.gmra.mxu1 %v1474_v29  ;;  %610 = vmatpush1.bf16.msra.mxu0 %v1457_v15 }
  0x8a   : > { %611 = vmatprep.subr.bf16.mxu0 %v1459_v17  ;;  %1305 = vmatprep.mubr.bf16.mxu0 %v1476_v31 }
  0x8b   : > { %683 = vmatprep.mubr.bf16.mxu1 %v1697_v0 }
  0x8d   : > { %612 = vmatpush1.bf16.msra.mxu0 %v1461_v18 }
  0x8e   : > { %613 = vmatprep.subr.bf16.mxu0 %v1463_v21 }
  0x90   : > { %1306 = vmatmul.mubr.bf16.gmra.mxu0 %v1477_v32 }
  0x91   : > { %684 = vmatmul.mubr.bf16.gmra.mxu1 %v1475_v30  ;;  %614 = vmatpush1.bf16.msra.mxu0 %v1465_v22 }
  0x92   : > { %615 = vmatprep.subr.bf16.mxu0 %v1467_v24  ;;  %633 = vmatprep.mubr.bf16.mxu0 %v1697_v0 }
  0x93   : > { %693 = vmatprep.mubr.bf16.mxu1 %v1697_v0 }
  0x95   : > { %616 = vmatpush1.bf16.msra.mxu0 %v1469_v25 }
  0x98   : > { %634 = vmatmul.mubr.bf16.vlgmr.msra.gmra.mxu0 %v1470_v19 }
  0x99   : > { %694 = vmatmul.mubr.bf16.gmra.mxu1 %v1476_v31  ;;  %643 = vmatprep.mubr.bf16.mxu0 %v1697_v0 }
  0x9a   : > { %703 = vmatprep.mubr.bf16.mxu1 %v1697_v0 }
  0xa0   : > { %644 = vmatmul.mubr.bf16.gmra.mxu0 %v1471_v26 }
  0xa1   : > { %704 = vmatmul.mubr.bf16.gmra.mxu1 %v1477_v32 }
 0x138   : > { %v1295_v33 = vpop.f32.mrf.mxu0 }
 0x139   : > { %v655_v34 = vpop.f32.mrf.mxu1 }
 0x13a   : > { %v442_v35 = vpop.f32.mrf.mxu0 }
 0x13b   : > { %v657_v36 = vpop.f32.mrf.mxu1 }
 0x13c   : > { %v1201_v37 = vpack.c.bf16 %v657_v36, %v655_v34  ;;  %v1296_v38 = vpop.f32.mrf.mxu0 }
 0x13d   : > { %v1222_v39 = vpack.c.bf16 %v1296_v38, %v1295_v33  ;;  %v659_v40 = vpop.f32.mrf.mxu1 }
 0x13e   : > { %894 = vst [vmem:[%s1912_s4 + $0x20] sm:$0xff] %v1201_v37  ;;  %v445_v41 = vpop.f32.mrf.mxu0 }
 0x13f   : > { %1254 = vst [vmem:[%s1917_s25 + $0x8] sm:$0xff] %v1222_v39   ;;  %v1217_v42 = vpack.c.bf16 %v445_v41, %v442_v35  ;;  %v661_v43 = vpop.f32.mrf.mxu1 }
 0x140   : > { %v1202_v44 = vpack.c.bf16 %v661_v43, %v659_v40  ;;  %v1299_v45 = vpop.f32.mrf.mxu0 }
 0x141   : > { %1218 = vst [vmem:[%s1917_s25] sm:$0xff] %v1217_v42   ;;  %v665_v46 = vpop.f32.mrf.mxu1 }
 0x142   : > { %895 = vst [vmem:[%s1912_s4 + $0x28] sm:$0xff] %v1202_v44  ;;  %v458_v47 = vpop.f32.mrf.mxu0 }
 0x143   : > { %v667_v48 = vpop.f32.mrf.mxu1 }
 0x144   : > { %v1203_v49 = vpack.c.bf16 %v667_v48, %v665_v46  ;;  %v1300_v50 = vpop.f32.mrf.mxu0 }
 0x145   : > { %v1232_v51 = vpack.c.bf16 %v1300_v50, %v1299_v45  ;;  %v669_v52 = vpop.f32.mrf.mxu1 }
 0x146   : > { %896 = vst [vmem:[%s1912_s4 + $0x30] sm:$0xff] %v1203_v49  ;;  %v461_v53 = vpop.f32.mrf.mxu0 }
 0x147   : > { %1256 = vst [vmem:[%s1917_s25 + $0x18] sm:$0xff] %v1232_v51   ;;  %v1227_v54 = vpack.c.bf16 %v461_v53, %v458_v47  ;;  %v671_v55 = vpop.f32.mrf.mxu1 }
 0x148   : > { %v1204_v56 = vpack.c.bf16 %v671_v55, %v669_v52  ;;  %v1303_v57 = vpop.f32.mrf.mxu0 }
 0x149   : > { %1255 = vst [vmem:[%s1917_s25 + $0x10] sm:$0xff] %v1227_v54   ;;  %v675_v58 = vpop.f32.mrf.mxu1 }
 0x14a   : > { %897 = vst [vmem:[%s1912_s4 + $0x38] sm:$0xff] %v1204_v56  ;;  %v474_v59 = vpop.f32.mrf.mxu0 }
 0x14b   : > { %v677_v60 = vpop.f32.mrf.mxu1 }
 0x14c   : > { %v1205_v61 = vpack.c.bf16 %v677_v60, %v675_v58  ;;  %v1304_v62 = vpop.f32.mrf.mxu0 }
 0x14d   : > { %v1242_v63 = vpack.c.bf16 %v1304_v62, %v1303_v57  ;;  %v679_v0 = vpop.f32.mrf.mxu1 }
 0x14e   : > { %898 = vst [vmem:[%s1912_s4 + $0x40] sm:$0xff] %v1205_v61  ;;  %v477_v1 = vpop.f32.mrf.mxu0 }
 0x14f   : > { %1258 = vst [vmem:[%s1917_s25 + $0x28] sm:$0xff] %v1242_v63   ;;  %v1237_v2 = vpack.c.bf16 %v477_v1, %v474_v59  ;;  %v681_v3 = vpop.f32.mrf.mxu1 }
 0x150   : > { %v1206_v4 = vpack.c.bf16 %v681_v3, %v679_v0  ;;  %v1307_v5 = vpop.f32.mrf.mxu0 }
 0x151   : > { %1257 = vst [vmem:[%s1917_s25 + $0x20] sm:$0xff] %v1237_v2   ;;  %v685_v6 = vpop.f32.mrf.mxu1 }
 0x152   : > { %899 = vst [vmem:[%s1912_s4 + $0x48] sm:$0xff] %v1206_v4  ;;  %v490_v7 = vpop.f32.mrf.mxu0 }
 0x153   : > { %v687_v8 = vpop.f32.mrf.mxu1 }
 0x154   : > { %v1207_v9 = vpack.c.bf16 %v687_v8, %v685_v6  ;;  %v1308_v10 = vpop.f32.mrf.mxu0 }
 0x155   : > { %v1252_v11 = vpack.c.bf16 %v1308_v10, %v1307_v5  ;;  %v689_v12 = vpop.f32.mrf.mxu1 }
 0x156   : > { %900 = vst [vmem:[%s1912_s4 + $0x50] sm:$0xff] %v1207_v9  ;;  %v493_v13 = vpop.f32.mrf.mxu0 }
 0x157   : > { %1260 = vst [vmem:[%s1917_s25 + $0x38] sm:$0xff] %v1252_v11   ;;  %v1247_v14 = vpack.c.bf16 %v493_v13, %v490_v7  ;;  %v691_v15 = vpop.f32.mrf.mxu1 }
 0x158   : > { %v1208_v16 = vpack.c.bf16 %v691_v15, %v689_v12  ;;  %v635_v17 = vpop.f32.mrf.mxu0 }
 0x159   : > { %1259 = vst [vmem:[%s1917_s25 + $0x30] sm:$0xff] %v1247_v14   ;;  %v695_v18 = vpop.f32.mrf.mxu1 }
 0x15a   : > { %901 = vst [vmem:[%s1912_s4 + $0x58] sm:$0xff] %v1208_v16  ;;  %v637_v19 = vpop.f32.mrf.mxu0 }
 0x15b   : > { %1571 = shalt.err (!%p1568_p2)
}
 0x15c   : > { %s1572_s14 = scalar_lea.hbm %s1939_s1, 1024  ;;  %s1576_s25 = scalar_lea.hbm %s2069_s10, 4096 }
 0x15d   : > { %p1573_p9 = scmp.ne.s32.totalorder %s1939_s1, %s1572_s14  ;;  %p1577_p13 = scmp.lt.s32.totalorder %s1939_s1, %s2069_s10 }
 0x15e   : > { %p1578_p10 = scmp.lt.s32.totalorder %s1576_s25, %s1572_s14 }
 0x15f   : > { %p1574_p11 = pnand %p1573_p9, %p2070_p4 }
 0x160   : > { %p1579_p7 = por %p1578_p10, %p1577_p13 }
 0x161   : > { %p1575_p12 = pneg %p1574_p11 }
 0x163   : > { %p1580_p1 = pnand %p1579_p7, %p1575_p12 }
 0x165   : > { %1583 = shalt.err (!%p1580_p1)
}
 0x166   : > { %s1699_s24 = smov 64   ;;  %s1700_s5 = smov 4   ;;  %v1197_v20 = vpack.c.bf16 %v637_v19, %v635_v17  ;;  %v697_v21 = vpop.f32.mrf.mxu1  ;;  %v639_v23 = vpop.f32.mrf.mxu0 }
 0x167   : > { %1335 = dma.vmem_to_hbm [thread:$0]  (%p2070_p4), %s1933_s30, 1024, %s1939_s1, %s907_s11, %s1699_s24, %s1699_s24, %s1700_s5   ;;  %v1209_v22 = vpack.c.bf16 %v697_v21, %v695_v18 }
 0x168   : > { %890 = vst [vmem:[%s1912_s4] sm:$0xff] %v1197_v20  ;;  %v699_v24 = vpop.f32.mrf.mxu1  ;;  %v641_v25 = vpop.f32.mrf.mxu0  ;;  %s1213_s26 = sshll.u32 %s1672_s18, 5  ;;  %s1177_s13 = sshll.u32 %s1676_s19, 6 }
 0x169   : > { %902 = vst [vmem:[%s1912_s4 + $0x60] sm:$0xff] %v1209_v22  ;;  %v1198_v26 = vpack.c.bf16 %v641_v25, %v639_v23  ;;  %s943_s30 = sadd.s32 %s1213_s26, %s1177_s13  ;;  %s946_s19 = sshll.u32 %s1912_s4, 4  ;;  %s1981_s19 = int_to_ptr.vmem [resolvable:$true] %s946_s19 }
 0x16a   : > { %v701_v27 = vpop.f32.mrf.mxu1  ;;  %v645_v29 = vpop.f32.mrf.mxu0  ;;  %s1178_s18 = sshll.u32 %s943_s30, 6  ;;  %s2071_s12 = sld [smem:[#allocation21_spill]] }
 0x16b   : > { %v1210_v28 = vpack.c.bf16 %v701_v27, %v699_v24  ;;  %891 = vst [vmem:[%s1912_s4 + $0x8] sm:$0xff] %v1198_v26  ;;  %s912_s28 = scalar_lea.sflag [#allocation10], %s1879_s7  ;;  %s1584_s6 = scalar_lea.vmem %s1981_s19, 2048 }
 0x16c   : > { %v705_v30 = vpop.f32.mrf.mxu1  ;;  %v647_v31 = vpop.f32.mrf.mxu0  ;;  %p1585_p6 = scmp.ne.s32.totalorder %s1981_s19, %s1584_s6  ;;  %s1701_s14 = smov [#allocation9]  }
 0x16d   : > { %903 = vst [vmem:[%s1912_s4 + $0x68] sm:$0xff] %v1210_v28  ;;  %v1199_v32 = vpack.c.bf16 %v647_v31, %v645_v29  ;;  %s1588_s23 = sshll.u32 %s1701_s14, 4  ;;  %s1589_s23 = int_to_ptr.vmem [resolvable:$false] %s1588_s23 }
 0x16e   : > { %v707_v33 = vpop.f32.mrf.mxu1  ;;  %v649_v35 = vpop.f32.mrf.mxu0  ;;  %p1586_p8 = pnand %p1585_p6, %p2070_p4  ;;  %s1590_s3 = scalar_lea.vmem %s1589_s23, 4096 }
 0x16f   : > { %v1211_v34 = vpack.c.bf16 %v707_v33, %v705_v30  ;;  %892 = vst [vmem:[%s1912_s4 + $0x10] sm:$0xff] %v1199_v32  ;;  %p1591_p0 = scmp.lt.s32.totalorder %s1981_s19, %s1589_s23  ;;  %p1592_p5 = scmp.lt.s32.totalorder %s1590_s3, %s1584_s6 }
 0x170   : > { %v709_v36 = vpop.f32.mrf.mxu1  ;;  %v651_v37 = vpop.f32.mrf.mxu0  ;;  %s1979_s15 = scalar_lea.hbm %s2071_s12, %s1178_s18  ;;  %p1587_p3 = pneg %p1586_p8 }
 0x171   : > { %904 = vst [vmem:[%s1912_s4 + $0x70] sm:$0xff] %v1211_v34  ;;  %v1200_v38 = vpack.c.bf16 %v651_v37, %v649_v35  ;;  %p1593_p2 = por %p1592_p5, %p1591_p0 }
 0x172   : > { %v711_v39 = vpop.f32.mrf.mxu1 }
 0x173   : > { %v1212_v40 = vpack.c.bf16 %v711_v39, %v709_v36  ;;  %893 = vst [vmem:[%s1912_s4 + $0x18] sm:$0xff] %v1200_v38  ;;  %p1594_p9 = pnand %p1593_p2, %p1587_p3 }
 0x175   : > { %905 = vst [vmem:[%s1912_s4 + $0x78] sm:$0xff] %v1212_v40 }
 0x176   : > { %1597 = shalt.err (!%p1594_p9)
}
 0x177   : > { %s1598_s4 = scalar_lea.hbm %s1979_s15, 2048  ;;  %s1602_s29 = scalar_lea.hbm %s2071_s12, 8192 }
 0x178   : > { %p1599_p11 = scmp.ne.s32.totalorder %s1979_s15, %s1598_s4  ;;  %p1603_p10 = scmp.lt.s32.totalorder %s1979_s15, %s2071_s12 }
 0x179   : > { %p1604_p7 = scmp.lt.s32.totalorder %s1602_s29, %s1598_s4 }
 0x17a   : > { %p1600_p12 = pnand %p1599_p11, %p2070_p4 }
 0x17b   : > { %p1605_p1 = por %p1604_p7, %p1603_p10 }
 0x17c   : > { %p1601_p13 = pneg %p1600_p12 }
 0x17e   : > { %p1606_p6 = pnand %p1605_p1, %p1601_p13 }
 0x180   : > { %1609 = shalt.err (!%p1606_p6)
}
 0x181   : > { %s1702_s26 = smov 128   ;;  %s1703_s13 = smov 8  }
 0x182   : > { %1336 = dma.vmem_to_hbm [thread:$0]  (%p2070_p4), %s1981_s19, 2048, %s1979_s15, %s912_s28, %s1702_s26, %s1702_s26, %s1703_s13  }
 0x183 PF: > { %s2072_s30 = sld [smem:[#allocation15_spill]]  ;;  %p1362_p8 = scmp.ge.s32.totalorder %s1688_s22, 2 }
 0x184   : > { %s2073_s18 = sld [smem:[#allocation16_spill]] }
 0x189   : > { %s961_s1 = sand.u32 1, %s2072_s30  }
 0x18a   : > { %p2074_p3 = scmp.ne.s32.totalorder %s2073_s18, 0  ;;  %s962_s11 = scalar_lea.sflag [#allocation4], %s961_s1 }
 0x18c   : > { %p1351_p0 = pnand %p1362_p8, %p2074_p3 }
 0x18e   : > { %p1352_p5 = pneg %p1351_p0 }
 0x190   : > { %1651 = dma.done.wait (%p1352_p5), %s962_s11, 1024  }
 0x191   : > { %1653 = vsyncadd (%p1352_p5), %s962_s11, 4294966272  ;;  %s971_s6 = scalar_lea.sflag [#allocation10], %s961_s1 }
 0x192   : > { %1655 = dma.done.wait (%p1352_p5), %s971_s6, 2048  }
 0x193   : > { %1657 = vsyncadd (%p1352_p5), %s971_s6, 4294965248  ;;  %s25_s22 = sadd.s32 1, %s1688_s22   ;;  %s2075_s8 = sld [smem:[#allocation17_spill]] }
 0x194   : > { %p22_p2 = scmp.ge.s32.totalorder %s25_s22, 6   ;;  %s2076_s15 = smov %s1664_s16 }
 0x195   : > { %s2077_s16 = smov %s1668_s17  ;;  %s2078_s17 = smov %s1856_s2 }
 0x196   : > { %s2079_s18 = smov %s1680_s20  ;;  %s2080_s19 = smov %s1684_s21 }
 0x197   : > { %s2082_s21 = smov %s2088_s9  ;;  %24 = sbr.rel (!%p22_p2) target bundleno = 15 (0xf), region = 102 }
 0x199   : > { %s2081_s20 = smov %s2075_s8 }
 0x19c   :  { %976 = vsyncpa [#allocation3], 1 }
 0x19d   :  { %978 = vsyncpa [#allocation3 + $0x1], 1 }
 0x19e   :  { %979 = vsyncpa [#allocation6], 1 }
 0x19f   :  { %980 = vsyncpa [#allocation4], 1 }
 0x1a0   :  { %982 = vsyncpa [#allocation4 + $0x1], 1 }
 0x1a1   :  { %983 = vsyncpa [#allocation10], 1 }
 0x1a2   :  { %985 = vsyncpa [#allocation10 + $0x1], 1 }

</bundles_post_ra>
